<compile_context>
chip_gen: v7x
topology: tpu7x:2x2x1
jax: 0.10.0
libtpu: 0.0.40
codegen_flags: <defaults>
</compile_context>

<pallas_src>
import functools

import jax
import jax.numpy as jnp
from jax.experimental import pallas as pl
from jax.experimental.pallas import tpu as pltpu

LN_EPS = 1e-5  # torch.nn.LayerNorm default


# --------------------------------------------------------------------------- helpers


def _ln(x, gamma, beta):
  # single-pass LayerNorm (one mean + one mean-of-squares)
  mu = jnp.mean(x, axis=-1, keepdims=True)
  ms = jnp.mean(x * x, axis=-1, keepdims=True)
  return (x - mu) * jax.lax.rsqrt(ms - mu * mu + LN_EPS) * gamma + beta


def _block_diag(mats, dtype):
  rows = sum(m.shape[0] for m in mats)
  cols = sum(m.shape[1] for m in mats)
  out = jnp.zeros((rows, cols), dtype)
  r = c = 0
  for m in mats:
    out = out.at[r:r + m.shape[0], c:c + m.shape[1]].set(m.astype(dtype))
    r += m.shape[0]
    c += m.shape[1]
  return out


def _round_up(x, m):
  return -(-x // m) * m


# --------------------------------------------------------------------------- kernels


def _parallel_kernel(x_ref, w1_ref, b1_ref, w2_ref, b2_ref, wh_ref, bh_ref,
                     g_ref, beta_ref, *rest, in_features, out_offsets,
                     out_sizes, in_ln_rows):
  n_ln = sum(r is not None for r in in_ln_rows)
  if n_ln:
    in_g_ref, in_b_ref, out_ref = rest
  else:
    (out_ref,) = rest

  total_out = sum(out_sizes)
  x = x_ref[...].astype(jnp.float32)

  # Shared input-LN statistics: identical for every block with input_layer_norm.
  if n_ln:
    mu_x = jnp.mean(x, axis=-1, keepdims=True)
    ms_x = jnp.mean(x * x, axis=-1, keepdims=True)
    xhat = (x - mu_x) * jax.lax.rsqrt(ms_x - mu_x * mu_x + LN_EPS)
    in_g = in_g_ref[...]
    in_b = in_b_ref[...]

  # Packed mask path: one matmul per stage covering ALL blocks.
  #   h1    = relu(x @ [w1_0 | w1_1 | ...])              K=in_f,    N=sum_agg
  #   masks =        h1 @ blockdiag(w2_0, w2_1, ...)     K=sum_agg, N=n*in_f
  h1 = jnp.dot(x_ref[...], w1_ref[...],
               preferred_element_type=jnp.float32) + b1_ref[...]
  h1 = jnp.maximum(h1, 0.0)
  masks = jnp.dot(h1.astype(w2_ref.dtype), w2_ref[...],
                  preferred_element_type=jnp.float32) + b2_ref[...]

  # Hidden layer: accumulate zero-padded wh blocks -> result is already the
  # concatenated per-block outputs (no jnp.concatenate, no sub-128 masked stores).
  acc = None
  for b, row in enumerate(in_ln_rows):
    if row is None:
      net_b = x
    else:
      net_b = xhat * in_g[row:row + 1, :] + in_b[row:row + 1, :]
    mask_b = masks[:, b * in_features:(b + 1) * in_features]
    nm = (net_b * mask_b).astype(wh_ref.dtype)
    part = jnp.dot(nm, wh_ref[pl.ds(b * in_features, in_features), :],
                   preferred_element_type=jnp.float32)
    acc = part if acc is None else acc + part
  hidden = acc + bh_ref[...]

  # Per-block output LayerNorm; assemble full-width mu / inv via lane-index selects
  # (pure VPU work) instead of concatenating per-block results.
  lane = jax.lax.broadcasted_iota(jnp.int32, (1, total_out), 1)
  mu_full = inv_full = None
  for off, sz in zip(out_offsets, out_sizes):
    seg = hidden[:, off:off + sz]
    mu = jnp.mean(seg, axis=-1, keepdims=True)
    ms = jnp.mean(seg * seg, axis=-1, keepdims=True)
    inv = jax.lax.rsqrt(ms - mu * mu + LN_EPS)
    if mu_full is None:
      mu_full, inv_full = mu, inv
    else:
      sel = lane >= off
      mu_full = jnp.where(sel, mu, mu_full)
      inv_full = jnp.where(sel, inv, inv_full)

  out = (hidden - mu_full) * inv_full * g_ref[...] + beta_ref[...]
  out_ref[...] = out.astype(out_ref.dtype)


def _serial_kernel(x_ref, w1_ref, b1_ref, w2_ref, b2_ref, *rest,
                   in_dims, in_offsets, has_in_ln):
  out_ref = rest[-1]
  prm = rest[:-1]
  x = x_ref[...].astype(jnp.float32)

  # Mask path depends only on `inputs` -> hoisted out of the serial chain and
  # computed for every block with two packed matmuls.
  h1 = jnp.dot(x_ref[...], w1_ref[...],
               preferred_element_type=jnp.float32) + b1_ref[...]
  h1 = jnp.maximum(h1, 0.0)
  masks = jnp.dot(h1.astype(w2_ref.dtype), w2_ref[...],
                  preferred_element_type=jnp.float32) + b2_ref[...]

  # Only the (net * mask) @ wh + LayerNorm chain is sequential.
  net = x
  k = 0
  for din, doff, ln in zip(in_dims, in_offsets, has_in_ln):
    if ln:
      net = _ln(net, prm[k][...], prm[k + 1][...])
      k += 2
    wh_ref, bh_ref, og_ref, ob_ref = prm[k:k + 4]
    k += 4
    mask_b = masks[:, doff:doff + din]
    hidden = jnp.dot((net * mask_b).astype(wh_ref.dtype), wh_ref[...],
                     preferred_element_type=jnp.float32) + bh_ref[...]
    net = _ln(hidden, og_ref[...], ob_ref[...])

  out_ref[...] = net.astype(out_ref.dtype)


# ------------------------------------------------------------------ packing / forward


def pack_masknet_params(block_params, in_features, *, use_parallel=True,
                        dtype=jnp.float32):
  """Init-time packing (do ONCE, not per forward call).

  Matmul weights are concatenated / block-diagonalised so the kernel issues a few
  wide MXU passes instead of 3 tiny matmuls per block; biases / LN vectors are
  packed into wide [1, N] rows and kept f32.
  """
  n = len(block_params)
  cat = lambda xs: jnp.concatenate(xs, axis=1)
  w1p = cat([p["w1"] for p in block_params]).astype(dtype)
  b1p = cat([p["b1"] for p in block_params]).astype(jnp.float32)

  if use_parallel:
    out_sizes = tuple(int(p["wh"].shape[1]) for p in block_params)
    out_offsets = tuple(int(sum(out_sizes[:i])) for i in range(n))
    w2bd = _block_diag([p["w2"] for p in block_params], dtype)   # [sum_agg, n*in_f]
    b2p = cat([p["b2"] for p in block_params]).astype(jnp.float32)
    whbd = _block_diag([p["wh"] for p in block_params], dtype)   # [n*in_f, total_out]
    bhp = cat([p["bh"] for p in block_params]).astype(jnp.float32)
    gp = cat([p["ln_g"] for p in block_params]).astype(jnp.float32)
    bp = cat([p["ln_b"] for p in block_params]).astype(jnp.float32)
    arrays = [w1p, b1p, w2bd, b2p, whbd, bhp, gp, bp]

    in_ln_rows, gs, bs = [], [], []
    for p in block_params:
      if "in_ln_g" in p:
        in_ln_rows.append(len(gs))
        gs.append(p["in_ln_g"])
        bs.append(p["in_ln_b"])
      else:
        in_ln_rows.append(None)
    if gs:
      arrays += [jnp.concatenate(gs, axis=0).astype(jnp.float32),
                 jnp.concatenate(bs, axis=0).astype(jnp.float32)]
    meta = dict(kind="parallel", in_features=int(in_features),
                out_offsets=out_offsets, out_sizes=out_sizes,
                in_ln_rows=tuple(in_ln_rows), total_out=int(sum(out_sizes)))
  else:
    in_dims = tuple([int(in_features)] +
                    [int(p["wh"].shape[1]) for p in block_params[:-1]])
    in_offsets = tuple(int(sum(in_dims[:i])) for i in range(n))
    w2bd = _block_diag([p["w2"] for p in block_params], dtype)   # [sum_agg, sum_in]
    b2p = cat([p["b2"] for p in block_params]).astype(jnp.float32)
    arrays = [w1p, b1p, w2bd, b2p]
    has_in_ln = []
    for p in block_params:
      ln = "in_ln_g" in p
      has_in_ln.append(ln)
      if ln:
        arrays += [p["in_ln_g"].astype(jnp.float32),
                   p["in_ln_b"].astype(jnp.float32)]
      arrays += [p["wh"].astype(dtype), p["bh"].astype(jnp.float32),
                 p["ln_g"].astype(jnp.float32), p["ln_b"].astype(jnp.float32)]
    meta = dict(kind="serial", in_features=int(in_features), in_dims=in_dims,
                in_offsets=in_offsets, has_in_ln=tuple(has_in_ln),
                total_out=int(block_params[-1]["wh"].shape[1]))
  return dict(arrays=arrays, dtype=dtype, meta=meta)


def _vmem_capacity():
  try:
    return int(pltpu.get_tpu_info().vmem_capacity_bytes)
  except Exception:
    return 64 * 1024 * 1024  # v7x per-TensorCore floor


def _choose_tile_b(B, row_bytes_in, row_bytes_out, resident_bytes, vmem_cap):
  budget = int(vmem_cap * 0.5)             # headroom for compiler scratch / spills
  # Resident (constant index_map) weights are double-buffered by Pallas -> 2x.
  stream = budget - 2 * resident_bytes
  per_row = 2 * (row_bytes_in + row_bytes_out)   # double-buffered activation tiles
  tile = max(stream // max(per_row, 1), 8)
  tile = int(min(tile, 4096))              # per-step overhead already negligible
  if B >= 16:
    # Keep grid >= 2 so ("parallel",) can shard the batch across both v7x
    # TensorCores (harmless on single-TC v5e/v6e).
    tile = min(tile, _round_up(-(-B // 2), 8))
  if tile >= B:
    return B
  return max(8, (tile // 8) * 8)


def masknet_forward(inputs, packed, *, tile_b=None):
  """Fused MaskNet forward: returns `shared_layer` ([B, total_out] parallel concat,
  or [B, out_size_last] serial). Partial final batch tiles are handled by Pallas
  masked stores (garbage rows never contaminate valid rows: all math is per-row)."""
  meta, arrays, dtype = packed["meta"], packed["arrays"], packed["dtype"]
  B, in_features = inputs.shape
  assert in_features == meta["in_features"]
  total_out = meta["total_out"]

  x = inputs.astype(dtype)
  itemsize = jnp.dtype(dtype).itemsize
  resident_bytes = sum(a.size * a.dtype.itemsize for a in arrays)
  vmem_cap = _vmem_capacity()
  if tile_b is None:
    tile_b = _choose_tile_b(B, in_features * itemsize, total_out * itemsize,
                            resident_bytes, vmem_cap)

  grid = (pl.cdiv(B, tile_b),)

  def resident(arr):   # same block every grid step -> stays VMEM-resident
    return pl.BlockSpec(arr.shape, lambda i: (0, 0))

  in_specs = [pl.BlockSpec((tile_b, in_features), lambda i: (i, 0))]
  in_specs += [resident(a) for a in arrays]
  out_specs = pl.BlockSpec((tile_b, total_out), lambda i: (i, 0))

  if meta["kind"] == "parallel":
    kernel = functools.partial(
        _parallel_kernel, in_features=in_features,
        out_offsets=meta["out_offsets"], out_sizes=meta["out_sizes"],
        in_ln_rows=meta["in_ln_rows"])
  else:
    kernel = functools.partial(
        _serial_kernel, in_dims=meta["in_dims"],
        in_offsets=meta["in_offsets"], has_in_ln=meta["has_in_ln"])

  # VMEM budget: 2x resident weights (double-buffered) + double-buffered
  # activation tiles, with margin, clamped to physical capacity.
  needed = 2 * resident_bytes + 2 * tile_b * (in_features + total_out) * itemsize
  vmem_limit = int(min(vmem_cap, max(2 * needed, 32 * 1024 * 1024)))

  return pl.pallas_call(
      kernel,
      out_shape=jax.ShapeDtypeStruct((B, total_out), dtype),
      grid_spec=pltpu.PrefetchScalarGridSpec(
          num_scalar_prefetch=0,
          grid=grid,
          in_specs=in_specs,
          out_specs=out_specs,
      ),
      compiler_params=pltpu.CompilerParams(
          dimension_semantics=("parallel",),
          vmem_limit_bytes=vmem_limit,
      ),
  )(x, *arrays)


# ----------------------------------------------------------------------------- init


def _xavier_uniform(key, fan_in, fan_out, dtype=jnp.float32):
  bound = (6.0 / (fan_in + fan_out)) ** 0.5
  return jax.random.uniform(key, (fan_in, fan_out), dtype, -bound, bound)


def init_block_params(key, input_dim, mask_input_dim, output_size, *,
                      reduction_factor=None, aggregation_size=None,
                      input_layer_norm=True):
  if reduction_factor is not None:
    aggregation_size = int(mask_input_dim * reduction_factor)
  elif aggregation_size is None:
    raise ValueError("Need one of reduction factor or aggregation size.")
  k1, k2, k3 = jax.random.split(key, 3)
  p = {
      "w1": _xavier_uniform(k1, mask_input_dim, aggregation_size),
      "b1": jnp.zeros((1, aggregation_size), jnp.float32),
      "w2": _xavier_uniform(k2, aggregation_size, input_dim),
      "b2": jnp.zeros((1, input_dim), jnp.float32),
      "wh": _xavier_uniform(k3, input_dim, output_size),
      "bh": jnp.zeros((1, output_size), jnp.float32),
      "ln_g": jnp.ones((1, output_size), jnp.float32),
      "ln_b": jnp.zeros((1, output_size), jnp.float32),
  }
  if input_layer_norm:
    p["in_ln_g"] = jnp.ones((1, input_dim), jnp.float32)
    p["in_ln_b"] = jnp.zeros((1, input_dim), jnp.float32)
  return p


# ------------------------------------------------------------------------ reference


def _layer_norm_ref(x, gamma, beta):
  mu = jnp.mean(x, axis=-1, keepdims=True)
  var = jnp.mean((x - mu) ** 2, axis=-1, keepdims=True)
  return (x - mu) * jax.lax.rsqrt(var + LN_EPS) * gamma + beta


def masknet_reference(inputs, block_params, *, use_parallel=True):
  x = inputs.astype(jnp.float32)

  def block(net, mask_in, p):
    if "in_ln_g" in p:
      net = _layer_norm_ref(net, p["in_ln_g"], p["in_ln_b"])
    h1 = jnp.maximum(mask_in @ p["w1"] + p["b1"], 0.0)
    mask = h1 @ p["w2"] + p["b2"]
    hidden = (net * mask) @ p["wh"] + p["bh"]
    return _layer_norm_ref(hidden, p["ln_g"], p["ln_b"])

  if use_parallel:
    return jnp.concatenate([block(x, x, p) for p in block_params], axis=-1)
  net = x
  for p in block_params:
    net = block(net, x, p)
  return net


# ----------------------------------------------------------------------------- main

if __name__ == "__main__":
  # TODO(synk): the optional trailing MLP head (mask_net_config.mlp) is not fused
  # here; when configured it is a plain dense stack applied to this output.

  batch = 8
  in_features = 32

  key = jax.random.PRNGKey(0)
  k_in, k_b0, k_b1, k_s0, k_s1 = jax.random.split(key, 5)
  inputs = jax.random.normal(k_in, (batch, in_features), jnp.float32)

  # ---- parallel MaskNet: 2 blocks x output_size=64 -> 128-wide lane-dense output
  par_blocks = [
      init_block_params(k_b0, in_features, in_features, 64,
                        reduction_factor=2.0, input_layer_norm=True),
      init_block_params(k_b1, in_features, in_features, 64,
                        reduction_factor=2.0, input_layer_norm=False),
  ]
  packed_par = pack_masknet_params(par_blocks, in_features, use_parallel=True)
  out_par = jax.block_until_ready(masknet_forward(inputs, packed_par))
  ref_par = masknet_reference(inputs, par_blocks, use_parallel=True)
  assert out_par.shape == (batch, 128)
  assert jnp.allclose(out_par, ref_par, atol=5e-4, rtol=5e-4), \
      "parallel MaskNet mismatch vs JAX reference"

  # ---- serial MaskNet: 32 -> 64 -> 128 (final output lane-dense)
  ser_blocks = [
      init_block_params(k_s0, in_features, in_features, 64,
                        reduction_factor=2.0, input_layer_norm=True),
      init_block_params(k_s1, 64, in_features, 128,
                        reduction_factor=2.0, input_layer_norm=True),
  ]
  packed_ser = pack_masknet_params(ser_blocks, in_features, use_parallel=False)
  out_ser = jax.block_until_ready(masknet_forward(inputs, packed_ser))
  ref_ser = masknet_reference(inputs, ser_blocks, use_parallel=False)
  assert out_ser.shape == (batch, 128)
  assert jnp.allclose(out_ser, ref_ser, atol=5e-4, rtol=5e-4), \
      "serial MaskNet mismatch vs JAX reference"

  # ---- bf16 activation/weight stream (halves HBM bytes + resident VMEM); dots
  # still accumulate f32 and LN math stays f32 -> loose tolerance vs f32 reference.
  packed_bf16 = pack_masknet_params(par_blocks, in_features, use_parallel=True,
                                    dtype=jnp.bfloat16)
  out_bf16 = jax.block_until_ready(masknet_forward(inputs, packed_bf16))
  assert out_bf16.shape == (batch, 128)
  assert jnp.allclose(out_bf16.astype(jnp.float32), ref_par,
                      atol=2e-1, rtol=5e-2), "bf16 MaskNet mismatch"

  print("KERNEL_OK")
</pallas_src>

<mosaic_0001>
module attributes {stable_mosaic.version = 11 : i64} {
  func.func @_parallel_kernel(%arg0: i32, %arg1: memref<8x32xf32, #tpu.memory_space<vmem>>, %arg2: memref<32x128xf32, #tpu.memory_space<vmem>>, %arg3: memref<1x128xf32, #tpu.memory_space<vmem>>, %arg4: memref<128x64xf32, #tpu.memory_space<vmem>>, %arg5: memref<1x64xf32, #tpu.memory_space<vmem>>, %arg6: memref<64x128xf32, #tpu.memory_space<vmem>>, %arg7: memref<1x128xf32, #tpu.memory_space<vmem>>, %arg8: memref<1x128xf32, #tpu.memory_space<vmem>>, %arg9: memref<1x128xf32, #tpu.memory_space<vmem>>, %arg10: memref<1x32xf32, #tpu.memory_space<vmem>>, %arg11: memref<1x32xf32, #tpu.memory_space<vmem>>, %arg12: memref<8x128xf32, #tpu.memory_space<vmem>>) attributes {dimension_semantics = [#tpu.dimension_semantics<parallel>], iteration_bounds = array<i64: 1>, scalar_prefetch = 0 : i64, scratch_operands = 0 : i64, tpu.core_type = #tpu.core_type<tc>, window_params = [{transform_indices = @transform_0, window_bounds = array<i64: 8, 32>}, {pipeline_mode = #tpu.pipeline_mode<synchronous>, transform_indices = @transform_1, window_bounds = array<i64: 32, 128>}, {pipeline_mode = #tpu.pipeline_mode<synchronous>, transform_indices = @transform_2, window_bounds = array<i64: 1, 128>}, {pipeline_mode = #tpu.pipeline_mode<synchronous>, transform_indices = @transform_3, window_bounds = array<i64: 128, 64>}, {pipeline_mode = #tpu.pipeline_mode<synchronous>, transform_indices = @transform_4, window_bounds = array<i64: 1, 64>}, {pipeline_mode = #tpu.pipeline_mode<synchronous>, transform_indices = @transform_5, window_bounds = array<i64: 64, 128>}, {pipeline_mode = #tpu.pipeline_mode<synchronous>, transform_indices = @transform_6, window_bounds = array<i64: 1, 128>}, {pipeline_mode = #tpu.pipeline_mode<synchronous>, transform_indices = @transform_7, window_bounds = array<i64: 1, 128>}, {pipeline_mode = #tpu.pipeline_mode<synchronous>, transform_indices = @transform_8, window_bounds = array<i64: 1, 128>}, {pipeline_mode = #tpu.pipeline_mode<synchronous>, transform_indices = @transform_9, window_bounds = array<i64: 1, 32>}, {pipeline_mode = #tpu.pipeline_mode<synchronous>, transform_indices = @transform_10, window_bounds = array<i64: 1, 32>}, {transform_indices = @transform_11, window_bounds = array<i64: 8, 128>}]} {
    %c0 = arith.constant 0 : index
    %c0_0 = arith.constant 0 : index
    %0 = vector.load %arg1[%c0, %c0_0] : memref<8x32xf32, #tpu.memory_space<vmem>>, vector<8x32xf32>
    %cst = arith.constant dense<0.000000e+00> : vector<8xf32>
    %1 = vector.multi_reduction <add>, %0, %cst [1] : vector<8x32xf32> to vector<8xf32>
    %2 = vector.shape_cast %1 : vector<8xf32> to vector<8x1xf32>
    %cst_1 = arith.constant 3.200000e+01 : f32
    %3 = vector.broadcast %cst_1 : f32 to vector<8x1xf32>
    %4 = arith.divf %2, %3 : vector<8x1xf32>
    %5 = arith.mulf %0, %0 : vector<8x32xf32>
    %cst_2 = arith.constant dense<0.000000e+00> : vector<8xf32>
    %6 = vector.multi_reduction <add>, %5, %cst_2 [1] : vector<8x32xf32> to vector<8xf32>
    %7 = vector.shape_cast %6 : vector<8xf32> to vector<8x1xf32>
    %cst_3 = arith.constant 3.200000e+01 : f32
    %8 = vector.broadcast %cst_3 : f32 to vector<8x1xf32>
    %9 = arith.divf %7, %8 : vector<8x1xf32>
    %10 = vector.broadcast %4 : vector<8x1xf32> to vector<8x32xf32>
    %11 = arith.subf %0, %10 : vector<8x32xf32>
    %12 = arith.mulf %4, %4 : vector<8x1xf32>
    %13 = arith.subf %9, %12 : vector<8x1xf32>
    %cst_4 = arith.constant 9.99999974E-6 : f32
    %14 = vector.broadcast %cst_4 : f32 to vector<8x1xf32>
    %15 = arith.addf %13, %14 : vector<8x1xf32>
    %16 = math.rsqrt %15 : vector<8x1xf32>
    %17 = vector.broadcast %16 : vector<8x1xf32> to vector<8x32xf32>
    %18 = arith.mulf %11, %17 : vector<8x32xf32>
    %c0_5 = arith.constant 0 : index
    %c0_6 = arith.constant 0 : index
    %19 = vector.load %arg10[%c0_5, %c0_6] : memref<1x32xf32, #tpu.memory_space<vmem>>, vector<1x32xf32>
    %c0_7 = arith.constant 0 : index
    %c0_8 = arith.constant 0 : index
    %20 = vector.load %arg11[%c0_7, %c0_8] : memref<1x32xf32, #tpu.memory_space<vmem>>, vector<1x32xf32>
    %c0_9 = arith.constant 0 : index
    %c0_10 = arith.constant 0 : index
    %21 = vector.load %arg1[%c0_9, %c0_10] : memref<8x32xf32, #tpu.memory_space<vmem>>, vector<8x32xf32>
    %c0_11 = arith.constant 0 : index
    %c0_12 = arith.constant 0 : index
    %22 = vector.load %arg2[%c0_11, %c0_12] : memref<32x128xf32, #tpu.memory_space<vmem>>, vector<32x128xf32>
    %cst_13 = arith.constant dense<0.000000e+00> : vector<8x128xf32>
    %23 = tpu.matmul %21, %22, %cst_13 {dimension_numbers = #tpu.dot_dimension_numbers<[1], [0], [0], [1], [0, 0, 1, 1], [], []>} : vector<8x32xf32>, vector<32x128xf32>, vector<8x128xf32> -> vector<8x128xf32>
    %c0_14 = arith.constant 0 : index
    %c0_15 = arith.constant 0 : index
    %24 = vector.load %arg3[%c0_14, %c0_15] : memref<1x128xf32, #tpu.memory_space<vmem>>, vector<1x128xf32>
    %25 = vector.broadcast %24 : vector<1x128xf32> to vector<8x128xf32>
    %26 = arith.addf %23, %25 : vector<8x128xf32>
    %cst_16 = arith.constant 0.000000e+00 : f32
    %27 = vector.broadcast %cst_16 : f32 to vector<8x128xf32>
    %28 = arith.maximumf %26, %27 : vector<8x128xf32>
    %c0_17 = arith.constant 0 : index
    %c0_18 = arith.constant 0 : index
    %29 = vector.load %arg4[%c0_17, %c0_18] : memref<128x64xf32, #tpu.memory_space<vmem>>, vector<128x64xf32>
    %cst_19 = arith.constant dense<0.000000e+00> : vector<8x64xf32>
    %30 = tpu.matmul %28, %29, %cst_19 {dimension_numbers = #tpu.dot_dimension_numbers<[1], [0], [0], [1], [0, 0, 1, 1], [], []>} : vector<8x128xf32>, vector<128x64xf32>, vector<8x64xf32> -> vector<8x64xf32>
    %c0_20 = arith.constant 0 : index
    %c0_21 = arith.constant 0 : index
    %31 = vector.load %arg5[%c0_20, %c0_21] : memref<1x64xf32, #tpu.memory_space<vmem>>, vector<1x64xf32>
    %32 = vector.broadcast %31 : vector<1x64xf32> to vector<8x64xf32>
    %33 = arith.addf %30, %32 : vector<8x64xf32>
    %34 = vector.broadcast %19 : vector<1x32xf32> to vector<8x32xf32>
    %35 = arith.mulf %18, %34 : vector<8x32xf32>
    %36 = vector.broadcast %20 : vector<1x32xf32> to vector<8x32xf32>
    %37 = arith.addf %35, %36 : vector<8x32xf32>
    %38 = vector.extract_strided_slice %33 {offsets = [0, 0], sizes = [8, 32], strides = [1, 1]} : vector<8x64xf32> to vector<8x32xf32>
    %39 = arith.mulf %37, %38 : vector<8x32xf32>
    %c0_22 = arith.constant 0 : index
    %c0_23 = arith.constant 0 : index
    %40 = vector.load %arg6[%c0_22, %c0_23] : memref<64x128xf32, #tpu.memory_space<vmem>>, vector<32x128xf32>
    %cst_24 = arith.constant dense<0.000000e+00> : vector<8x128xf32>
    %41 = tpu.matmul %39, %40, %cst_24 {dimension_numbers = #tpu.dot_dimension_numbers<[1], [0], [0], [1], [0, 0, 1, 1], [], []>} : vector<8x32xf32>, vector<32x128xf32>, vector<8x128xf32> -> vector<8x128xf32>
    %42 = vector.extract_strided_slice %33 {offsets = [0, 32], sizes = [8, 32], strides = [1, 1]} : vector<8x64xf32> to vector<8x32xf32>
    %43 = arith.mulf %0, %42 : vector<8x32xf32>
    %c32 = arith.constant 32 : index
    %c0_25 = arith.constant 0 : index
    %44 = vector.load %arg6[%c32, %c0_25] : memref<64x128xf32, #tpu.memory_space<vmem>>, vector<32x128xf32>
    %cst_26 = arith.constant dense<0.000000e+00> : vector<8x128xf32>
    %45 = tpu.matmul %43, %44, %cst_26 {dimension_numbers = #tpu.dot_dimension_numbers<[1], [0], [0], [1], [0, 0, 1, 1], [], []>} : vector<8x32xf32>, vector<32x128xf32>, vector<8x128xf32> -> vector<8x128xf32>
    %46 = arith.addf %41, %45 : vector<8x128xf32>
    %c0_27 = arith.constant 0 : index
    %c0_28 = arith.constant 0 : index
    %47 = vector.load %arg7[%c0_27, %c0_28] : memref<1x128xf32, #tpu.memory_space<vmem>>, vector<1x128xf32>
    %48 = vector.broadcast %47 : vector<1x128xf32> to vector<8x128xf32>
    %49 = arith.addf %46, %48 : vector<8x128xf32>
    %50 = tpu.iota {dimensions = array<i32: 1>} : vector<1x128xi32>
    %51 = vector.extract_strided_slice %49 {offsets = [0, 0], sizes = [8, 64], strides = [1, 1]} : vector<8x128xf32> to vector<8x64xf32>
    %cst_29 = arith.constant dense<0.000000e+00> : vector<8xf32>
    %52 = vector.multi_reduction <add>, %51, %cst_29 [1] : vector<8x64xf32> to vector<8xf32>
    %53 = vector.shape_cast %52 : vector<8xf32> to vector<8x1xf32>
    %cst_30 = arith.constant 6.400000e+01 : f32
    %54 = vector.broadcast %cst_30 : f32 to vector<8x1xf32>
    %55 = arith.divf %53, %54 : vector<8x1xf32>
    %56 = arith.mulf %51, %51 : vector<8x64xf32>
    %cst_31 = arith.constant dense<0.000000e+00> : vector<8xf32>
    %57 = vector.multi_reduction <add>, %56, %cst_31 [1] : vector<8x64xf32> to vector<8xf32>
    %58 = vector.shape_cast %57 : vector<8xf32> to vector<8x1xf32>
    %cst_32 = arith.constant 6.400000e+01 : f32
    %59 = vector.broadcast %cst_32 : f32 to vector<8x1xf32>
    %60 = arith.divf %58, %59 : vector<8x1xf32>
    %61 = arith.mulf %55, %55 : vector<8x1xf32>
    %62 = arith.subf %60, %61 : vector<8x1xf32>
    %cst_33 = arith.constant 9.99999974E-6 : f32
    %63 = vector.broadcast %cst_33 : f32 to vector<8x1xf32>
    %64 = arith.addf %62, %63 : vector<8x1xf32>
    %65 = math.rsqrt %64 : vector<8x1xf32>
    %66 = vector.extract_strided_slice %49 {offsets = [0, 64], sizes = [8, 64], strides = [1, 1]} : vector<8x128xf32> to vector<8x64xf32>
    %cst_34 = arith.constant dense<0.000000e+00> : vector<8xf32>
    %67 = vector.multi_reduction <add>, %66, %cst_34 [1] : vector<8x64xf32> to vector<8xf32>
    %68 = vector.shape_cast %67 : vector<8xf32> to vector<8x1xf32>
    %cst_35 = arith.constant 6.400000e+01 : f32
    %69 = vector.broadcast %cst_35 : f32 to vector<8x1xf32>
    %70 = arith.divf %68, %69 : vector<8x1xf32>
    %71 = arith.mulf %66, %66 : vector<8x64xf32>
    %cst_36 = arith.constant dense<0.000000e+00> : vector<8xf32>
    %72 = vector.multi_reduction <add>, %71, %cst_36 [1] : vector<8x64xf32> to vector<8xf32>
    %73 = vector.shape_cast %72 : vector<8xf32> to vector<8x1xf32>
    %cst_37 = arith.constant 6.400000e+01 : f32
    %74 = vector.broadcast %cst_37 : f32 to vector<8x1xf32>
    %75 = arith.divf %73, %74 : vector<8x1xf32>
    %76 = arith.mulf %70, %70 : vector<8x1xf32>
    %77 = arith.subf %75, %76 : vector<8x1xf32>
    %cst_38 = arith.constant 9.99999974E-6 : f32
    %78 = vector.broadcast %cst_38 : f32 to vector<8x1xf32>
    %79 = arith.addf %77, %78 : vector<8x1xf32>
    %80 = math.rsqrt %79 : vector<8x1xf32>
    %c64_i32 = arith.constant 64 : i32
    %81 = vector.broadcast %c64_i32 : i32 to vector<1x128xi32>
    %82 = arith.cmpi sge, %50, %81 : vector<1x128xi32>
    %83 = vector.shape_cast %82 : vector<1x128xi1> to vector<1x128xi1>
    %84 = vector.broadcast %83 : vector<1x128xi1> to vector<8x128xi1>
    %85 = vector.shape_cast %70 : vector<8x1xf32> to vector<8x1xf32>
    %86 = vector.broadcast %85 : vector<8x1xf32> to vector<8x128xf32>
    %87 = vector.shape_cast %55 : vector<8x1xf32> to vector<8x1xf32>
    %88 = vector.broadcast %87 : vector<8x1xf32> to vector<8x128xf32>
    %89 = arith.select %84, %86, %88 : vector<8x128xi1>, vector<8x128xf32>
    %90 = vector.shape_cast %82 : vector<1x128xi1> to vector<1x128xi1>
    %91 = vector.broadcast %90 : vector<1x128xi1> to vector<8x128xi1>
    %92 = vector.shape_cast %80 : vector<8x1xf32> to vector<8x1xf32>
    %93 = vector.broadcast %92 : vector<8x1xf32> to vector<8x128xf32>
    %94 = vector.shape_cast %65 : vector<8x1xf32> to vector<8x1xf32>
    %95 = vector.broadcast %94 : vector<8x1xf32> to vector<8x128xf32>
    %96 = arith.select %91, %93, %95 : vector<8x128xi1>, vector<8x128xf32>
    %97 = arith.subf %49, %89 : vector<8x128xf32>
    %98 = arith.mulf %97, %96 : vector<8x128xf32>
    %c0_39 = arith.constant 0 : index
    %c0_40 = arith.constant 0 : index
    %99 = vector.load %arg8[%c0_39, %c0_40] : memref<1x128xf32, #tpu.memory_space<vmem>>, vector<1x128xf32>
    %100 = vector.broadcast %99 : vector<1x128xf32> to vector<8x128xf32>
    %101 = arith.mulf %98, %100 : vector<8x128xf32>
    %c0_41 = arith.constant 0 : index
    %c0_42 = arith.constant 0 : index
    %102 = vector.load %arg9[%c0_41, %c0_42] : memref<1x128xf32, #tpu.memory_space<vmem>>, vector<1x128xf32>
    %103 = vector.broadcast %102 : vector<1x128xf32> to vector<8x128xf32>
    %104 = arith.addf %101, %103 : vector<8x128xf32>
    %c0_43 = arith.constant 0 : index
    %c0_44 = arith.constant 0 : index
    %105 = vector.load %arg12[%c0_43, %c0_44] : memref<8x128xf32, #tpu.memory_space<vmem>>, vector<8x128xf32>
    tpu.vector_store %arg12[%c0_43, %c0_44], %104 {strides = array<i32>} : memref<8x128xf32, #tpu.memory_space<vmem>>, vector<8x128xf32>,
    return
  }
  func.func @transform_0(%arg0: i32) -> (i32, i32) {
    %c0_i32 = arith.constant 0 : i32
    %c0_i32_0 = arith.constant 0 : i32
    return %arg0, %c0_i32 : i32, i32
  }
  func.func @transform_1(%arg0: i32) -> (i32, i32) {
    %c0_i32 = arith.constant 0 : i32
    %c0_i32_0 = arith.constant 0 : i32
    %c0_i32_1 = arith.constant 0 : i32
    return %c0_i32, %c0_i32_0 : i32, i32
  }
  func.func @transform_2(%arg0: i32) -> (i32, i32) {
    %c0_i32 = arith.constant 0 : i32
    %c0_i32_0 = arith.constant 0 : i32
    %c0_i32_1 = arith.constant 0 : i32
    return %c0_i32, %c0_i32_0 : i32, i32
  }
  func.func @transform_3(%arg0: i32) -> (i32, i32) {
    %c0_i32 = arith.constant 0 : i32
    %c0_i32_0 = arith.constant 0 : i32
    %c0_i32_1 = arith.constant 0 : i32
    return %c0_i32, %c0_i32_0 : i32, i32
  }
  func.func @transform_4(%arg0: i32) -> (i32, i32) {
    %c0_i32 = arith.constant 0 : i32
    %c0_i32_0 = arith.constant 0 : i32
    %c0_i32_1 = arith.constant 0 : i32
    return %c0_i32, %c0_i32_0 : i32, i32
  }
  func.func @transform_5(%arg0: i32) -> (i32, i32) {
    %c0_i32 = arith.constant 0 : i32
    %c0_i32_0 = arith.constant 0 : i32
    %c0_i32_1 = arith.constant 0 : i32
    return %c0_i32, %c0_i32_0 : i32, i32
  }
  func.func @transform_6(%arg0: i32) -> (i32, i32) {
    %c0_i32 = arith.constant 0 : i32
    %c0_i32_0 = arith.constant 0 : i32
    %c0_i32_1 = arith.constant 0 : i32
    return %c0_i32, %c0_i32_0 : i32, i32
  }
  func.func @transform_7(%arg0: i32) -> (i32, i32) {
    %c0_i32 = arith.constant 0 : i32
    %c0_i32_0 = arith.constant 0 : i32
    %c0_i32_1 = arith.constant 0 : i32
    return %c0_i32, %c0_i32_0 : i32, i32
  }
  func.func @transform_8(%arg0: i32) -> (i32, i32) {
    %c0_i32 = arith.constant 0 : i32
    %c0_i32_0 = arith.constant 0 : i32
    %c0_i32_1 = arith.constant 0 : i32
    return %c0_i32, %c0_i32_0 : i32, i32
  }
  func.func @transform_9(%arg0: i32) -> (i32, i32) {
    %c0_i32 = arith.constant 0 : i32
    %c0_i32_0 = arith.constant 0 : i32
    %c0_i32_1 = arith.constant 0 : i32
    return %c0_i32, %c0_i32_0 : i32, i32
  }
  func.func @transform_10(%arg0: i32) -> (i32, i32) {
    %c0_i32 = arith.constant 0 : i32
    %c0_i32_0 = arith.constant 0 : i32
    %c0_i32_1 = arith.constant 0 : i32
    return %c0_i32, %c0_i32_0 : i32, i32
  }
  func.func @transform_11(%arg0: i32) -> (i32, i32) {
    %c0_i32 = arith.constant 0 : i32
    %c0_i32_0 = arith.constant 0 : i32
    return %arg0, %c0_i32 : i32, i32
  }
}

</mosaic_0001>

<bundles_post_ra>
// kernel: tpu_custom_call.1
= control target key start
LH: loop header
LB: loop body
LE: loop exit
PB: predicated region body
PF: predicated region fallthrough
CT: control target
= control target key end

     0   :  { %v682_v3 = vmov 0.0|0.0   ;;  %vm683_vm0 = vmmov 0   ;;  %v684_v6 = vmov 0.0   ;;  %s903_s0 = inlined_call_operand.vmem [shape: f32[8,32], index: 0, kind: input, shape index: {}]   ;;  %s904_s1 = inlined_call_operand.vmem [shape: f32[32,128], index: 1, kind: input, shape index: {}]   ;;  %s905_s2 = inlined_call_operand.vmem [shape: f32[1,128], index: 2, kind: input, shape index: {}]   ;;  %s906_s3 = inlined_call_operand.vmem [shape: f32[128,64], index: 3, kind: input, shape index: {}]   ;;  %s907_s4 = inlined_call_operand.vmem [shape: f32[1,64], index: 4, kind: input, shape index: {}]   ;;  %s908_s5 = inlined_call_operand.vmem [shape: f32[64,128], index: 5, kind: input, shape index: {}]   ;;  %s909_s6 = inlined_call_operand.vmem [shape: f32[1,128], index: 6, kind: input, shape index: {}]   ;;  %s910_s7 = inlined_call_operand.vmem [shape: f32[1,128], index: 7, kind: input, shape index: {}]   ;;  %s911_s8 = inlined_call_operand.vmem [shape: f32[1,128], index: 8, kind: input, shape index: {}]   ;;  %s912_s9 = inlined_call_operand.vmem [shape: f32[1,32], index: 9, kind: input, shape index: {}]   ;;  %s913_s10 = inlined_call_operand.vmem [shape: f32[1,32], index: 10, kind: input, shape index: {}]   ;;  %s914_s11 = inlined_call_operand.hbm [shape: f32[8,128], index: 11, kind: output, shape index: {}]  }
   0x1   :  { %v59_v0 = vld [vmem:[%s904_s1] sm:$0xff]  ;;  %v60_v1 = vld [vmem:[%s904_s1 + $0x8] sm:$0xff]  ;;  %v61_v2 = vld [vmem:[%s904_s1 + $0x10] sm:$0xff]  ;;  %604 = vmatprep.subr.bf16.mxu0 %v682_v3  ;;  %544 = vmatprep.mubr.msk.f32.mxu0 %vm683_vm0, %v684_v6 }
   0x2   :  { %v605_v4 = vpack.c.bf16 %v60_v1, %v59_v0  ;;  %v62_v5 = vld [vmem:[%s904_s1 + $0x18] sm:$0xff]  ;;  %v144_v7 = vld [vmem:[%s906_s3] sm:$0xff]  ;;  %610 = vmatprep.subr.bf16.mxu1 %v682_v3  ;;  %v145_v8 = vld [vmem:[%s906_s3 + $0x8] sm:$0xff]  ;;  %579 = vmatprep.mubr.msk.f32.mxu1 %vm683_vm0, %v684_v6 }
   0x3   :  { %v146_v9 = vld [vmem:[%s906_s3 + $0x10] sm:$0xff]  ;;  %v147_v10 = vld [vmem:[%s906_s3 + $0x18] sm:$0xff]  ;;  %v608_v11 = vpack.c.bf16 %v62_v5, %v61_v2  ;;  %v611_v12 = vpack.c.bf16 %v145_v8, %v144_v7  ;;  %v148_v14 = vld [vmem:[%s906_s3 + $0x20] sm:$0xff] }
   0x4   :  { %606 = vmatpush3.bf16.msra.mxu0 %v605_v4  ;;  %v614_v13 = vpack.c.bf16 %v147_v10, %v146_v9  ;;  %v149_v15 = vld [vmem:[%s906_s3 + $0x28] sm:$0xff] }
   0x5   :  { %607 = vmatprep.subr.bf16.mxu0 %v682_v3  ;;  %612 = vmatpush3.bf16.msra.mxu1 %v611_v12 }
   0x6   :  { %613 = vmatprep.subr.bf16.mxu1 %v682_v3 }
   0x7   :  { %16 = vsyncpa [#allocation3], 0  ;;  %v789_v16 = vld [vmem:[%s903_s0] sm:$0xff]  ;;  %vm40_vm1 = vcmask 261120   ;;  %v617_v17 = vpack.c.bf16 %v149_v15, %v148_v14  ;;  %v150_v18 = vld [vmem:[%s906_s3 + $0x30] sm:$0xff]  ;;  %s685_s27 = smov 96  }
   0x8   :  { %609 = vmatpush3.bf16.msra.mxu0 %v608_v11  ;;  %v151_v19 = vld [vmem:[%s906_s3 + $0x38] sm:$0xff]  ;;  %v152_v21 = vld [vmem:[%s906_s3 + $0x40] sm:$0xff]  ;;  %v153_v22 = vld [vmem:[%s906_s3 + $0x48] sm:$0xff]  ;;  %v41_v33 = vsel %vm40_vm1, %v789_v16, 0.0  ;;  %v46_v34 = vmul.f32 %v789_v16, %v789_v16  ;;  %vm421_vm2 = vcmask 523264   ;;  %s687_s21 = smov [#allocation2]  }
   0x9   :  { %634 = vmatprep.subr.bf16.mxu0 %v682_v3  ;;  %615 = vmatpush3.bf16.msra.mxu1 %v614_v13  ;;  %v620_v20 = vpack.c.bf16 %v151_v19, %v150_v18  ;;  %v623_v23 = vpack.c.bf16 %v153_v22, %v152_v21  ;;  %v154_v24 = vld [vmem:[%s906_s3 + $0x50] sm:$0xff]  ;;  %v155_v25 = vld [vmem:[%s906_s3 + $0x58] sm:$0xff]  ;;  %v156_v27 = vld [vmem:[%s906_s3 + $0x60] sm:$0xff]  ;;  %s486_s22 = sshll.u32 %s687_s21, 4  ;;  %s487_s22 = int_to_ptr.vmem [resolvable:$true] %s486_s22 }
   0xa   :  { %616 = vmatprep.subr.bf16.mxu1 %v682_v3  ;;  %v626_v26 = vpack.c.bf16 %v155_v25, %v154_v24  ;;  %v157_v28 = vld [vmem:[%s906_s3 + $0x68] sm:$0xff]  ;;  %v158_v30 = vld [vmem:[%s906_s3 + $0x70] sm:$0xff]  ;;  %v159_v31 = vld [vmem:[%s906_s3 + $0x78] sm:$0xff]  ;;  %42 = vadd.xlane.f32.xlu0 %v41_v33  ;;  %v47_v35 = vsel %vm40_vm1, %v46_v34, 0.0  ;;  %s658_s0 = scalar_lea.vmem %s487_s22, 128  ;;  %p663_p1 = scmp.lt.s32.totalorder %s487_s22, %s487_s22 }
   0xb   :  { %545 = vmatmul.mubr.msk.f32.vlgmr.msra.gmra.mrb[0].mxu0 %vm40_vm1, %v789_v16  ;;  %v629_v29 = vpack.c.bf16 %v157_v28, %v156_v27  ;;  %v632_v32 = vpack.c.bf16 %v159_v31, %v158_v30  ;;  %v494_v36 = vld [vmem:[%s905_s2] ss:$0 sm:$0xff]  ;;  %v262_v42 = vld [vmem:[%s908_s5 + $0x28] sm:$0xff]  ;;  %v263_v43 = vld [vmem:[%s908_s5 + $0x30] sm:$0xff]  ;;  %p659_p0 = scmp.ne.s32.totalorder %s487_s22, %s658_s0  ;;  %p664_p2 = scmp.lt.s32.totalorder %s658_s0, %s658_s0 }
   0xc   :  { %590 = vmatprep.mubr.msk.f32.mxu0 %vm683_vm0, %v684_v6  ;;  %v261_v41 = vld [vmem:[%s908_s5 + $0x20] sm:$0xff]  ;;  %v264_v45 = vld [vmem:[%s908_s5 + $0x38] sm:$0xff]  ;;  %v253_v62 = vld [vmem:[%s908_s5 + $0x8] sm:$0xff] }
   0xd   :  { %618 = vmatpush3.bf16.msra.mxu1 %v617_v17  ;;  %v635_v44 = vpack.c.bf16 %v262_v42, %v261_v41  ;;  %v638_v46 = vpack.c.bf16 %v264_v45, %v263_v43  ;;  %v496_v47 = vld [vmem:[%s907_s4] ss:$0 sm:$0xff]  ;;  %v254_v5 = vld [vmem:[%s908_s5 + $0x10] sm:$0xff]  ;;  %v255_v7 = vld [vmem:[%s908_s5 + $0x18] sm:$0xff]  ;;  %p665_p3 = por %p664_p2, %p663_p1 }
   0xe   :  { %619 = vmatprep.subr.bf16.mxu1 %v682_v3  ;;  %48 = vadd.xlane.f32.xlu0 %v47_v35  ;;  %v252_v61 = vld [vmem:[%s908_s5] sm:$0xff]  ;;  %v644_v9 = vpack.c.bf16 %v255_v7, %v254_v5 }
   0xf   :  { %636 = vmatpush3.bf16.msra.mxu0 %v635_v44  ;;  %v497_v63 = vld [vmem:[%s912_s9] ss:$0 sm:$0xff]  ;;  %v641_v1 = vpack.c.bf16 %v253_v62, %v252_v61  ;;  %p666_p4 = pnand %p665_p3, %p659_p0 }
  0x10   :  { %637 = vmatprep.subr.bf16.mxu0 %v682_v3  ;;  %v498_v8 = vld [vmem:[%s913_s10] ss:$0 sm:$0xff]  ;;  %s686_s10 = smov 64  }
  0x11   :  { %621 = vmatpush3.bf16.msra.mxu1 %v620_v20  ;;  %v501_v15 = vld [vmem:[%s909_s6] ss:$0 sm:$0xff] }
  0x12   :  { %622 = vmatprep.subr.bf16.mxu1 %v682_v3  ;;  %v502_v45 = vld [vmem:[%s910_s7] ss:$0 sm:$0xff] }
  0x13   :  { %639 = vmatpush3.bf16.msra.mxu0 %v638_v46 }
  0x14   :  { %640 = vmatprep.subr.bf16.mxu0 %v682_v3 }
  0x15   :  { %624 = vmatpush3.bf16.msra.mxu1 %v623_v23 }
  0x16   :  { %625 = vmatprep.subr.bf16.mxu1 %v682_v3 }
  0x19   :  { %627 = vmatpush3.bf16.msra.mxu1 %v626_v26 }
  0x1a   :  { %628 = vmatprep.subr.bf16.mxu1 %v682_v3 }
  0x1d   :  { %630 = vmatpush3.bf16.msra.mxu1 %v629_v29 }
  0x1e   :  { %631 = vmatprep.subr.bf16.mxu1 %v682_v3 }
  0x21   :  { %633 = vmatpush3.bf16.msra.mxu1 %v632_v32 }
  0x97   :  { %v43_v51 = vpop.xlane.xlu0 %42 }
  0x98   :  { %v45_v52 = vmul.f32 0.03125, %v43_v51 }
  0x9a   :  { %v52_v54 = vmul.f32 %v45_v52, %v45_v52  ;;  %v51_v58 = vsub.f32 %v789_v16, %v45_v52 }
  0x9b   :  { %v49_v53 = vpop.xlane.xlu0 %48 }
  0x9c   :  { %v50_v55 = vmul.f32 0.03125, %v49_v53 }
  0x9e   :  { %v53_v56 = vsub.f32 %v50_v55, %v52_v54 }
  0xa0   :  { %v54_v57 = vadd.f32 1e-05, %v53_v56 }
  0xa2   :  { %652 = vrsqrt.f32 %v54_v57 }
  0xac   :  { %v653_v59 = vpop.eup %652 }
  0xad   :  { %v56_v60 = vmul.f32 %v653_v59, %v51_v58 }
  0xaf   :  { %v243_v2 = vmul.f32 %v497_v63, %v56_v60 }
  0xb1   :  { %v250_v10 = vadd.f32 %v498_v8, %v243_v2 }
  0xde   :  { %v139_v37 = vpop.f32.mrb[0].mxu0 }
  0xdf   :  { %v140_v38 = vadd.f32 %v494_v36, %v139_v37  ;;  %v546_v39 = vpop.f32.mrb[1].mxu0  ;;  %v419_v36 = vlaneseq }
  0xe1   :  { %v143_v40 = vmax.f32 %v140_v38, 0.0  ;;  %v420_v39 = vand.u32 127, %v419_v36 }
  0xe3   :  { %580 = vmatmul.mubr.f32.vlgmr.msra.gmra.mrb[0].mxu1 %v143_v40  ;;  %vm456_vm3 = vcmp.ge.s32.totalorder %v420_v39, 64 }
 0x1b6   :  { %v233_v48 = vpop.f32.mrb[0].mxu1 }
 0x1b7   :  { %v234_v49 = vadd.f32 %v496_v47, %v233_v48  ;;  %v581_v50 = vpop.f32.mrb[1].mxu1  ;;  %v503_v47 = vld [vmem:[%s911_s8] ss:$0 sm:$0xff] }
 0x1b9   :  { %257 = vrot.lane.b32.xlu1 %v234_v49, %s685_s27  ;;  %v251_v11 = vmul.f32 %v250_v10, %v234_v49 }
 0x22b   :  { %v258_v0 = vpop.permute.xlu1 %257 }
 0x22c   :  { %v260_v4 = vmul.f32 %v258_v0, %v789_v16 }
 0x22e   :  { %591 = vmatmul.mubr.msk.f32.vlgmr.msra.gmra.mrb[2].mxu0 %vm40_vm1, %v260_v4 }
 0x22f   :  { %642 = vmatpush3.bf16.msra.mxu0 %v641_v1  ;;  %601 = vmatprep.mubr.msk.f32.mxu0 %vm683_vm0, %v684_v6 }
 0x230   :  { %643 = vmatprep.subr.bf16.mxu0 %v682_v3 }
 0x233   :  { %645 = vmatpush3.bf16.msra.mxu0 %v644_v9 }
 0x236   :  { %602 = vmatmul.mubr.msk.f32.vlgmr.msra.gmra.mrb[4].mxu0 %vm40_vm1, %v251_v11 }
 0x301   :  { %v334_v12 = vpop.f32.mrb[2].mxu0 }
 0x302   :  { %v592_v13 = vpop.f32.mrb[3].mxu0 }
 0x309   :  { %v407_v14 = vpop.f32.mrb[4].mxu0 }
 0x30a   :  { %v408_v16 = vadd.f32 %v407_v14, %v334_v12  ;;  %v603_v17 = vpop.f32.mrb[5].mxu0 }
 0x30c   :  { %v418_v18 = vadd.f32 %v501_v15, %v408_v16 }
 0x30e   :  { %437 = vrot.lane.b32.xlu1 %v418_v18, %s686_s10  ;;  %v427_v6 = vmul.f32 %v418_v18, %v418_v18  ;;  %v422_v3 = vsel %vm421_vm2, %v418_v18, 0.0 }
 0x310   :  { %445 = vrot.lane.b32.xlu0 %v427_v6, %s686_s10  ;;  %v428_v19 = vsel %vm421_vm2, %v427_v6, 0.0 }
 0x332   :  { %423 = vadd.xlane.f32.xlu1 %v422_v3 }
 0x336   :  { %429 = vadd.xlane.f32.xlu1 %v428_v19 }
 0x380   :  { %v438_v20 = vpop.permute.xlu1 %437 }
 0x381   :  { %v440_v21 = vsel %vm421_vm2, %v438_v20, 0.0 }
 0x382   :  { %441 = vadd.xlane.f32.xlu0 %v440_v21  ;;  %v446_v22 = vpop.permute.xlu0 %445 }
 0x383   :  { %v448_v23 = vsel %vm421_vm2, %v446_v22, 0.0 }
 0x384   :  { %449 = vadd.xlane.f32.xlu1 %v448_v23 }
 0x3bf   :  { %v424_v24 = vpop.xlane.xlu1 %423 }
 0x3c0   :  { %v426_v26 = vmul.f32 0.015625, %v424_v24 }
 0x3c2   :  { %v432_v28 = vmul.f32 %v426_v26, %v426_v26 }
 0x3c3   :  { %v430_v25 = vpop.xlane.xlu1 %429 }
 0x3c4   :  { %v431_v27 = vmul.f32 0.015625, %v430_v25 }
 0x3c6   :  { %v433_v29 = vsub.f32 %v431_v27, %v432_v28 }
 0x3c8   :  { %v434_v35 = vadd.f32 1e-05, %v433_v29 }
 0x3ca   :  { %654 = vrsqrt.f32 %v434_v35 }
 0x3d4   :  { %v655_v41 = vpop.eup %654 }
 0x40f   :  { %v442_v30 = vpop.xlane.xlu0 %441 }
 0x410   :  { %v443_v31 = vmul.f32 0.015625, %v442_v30 }
 0x411   :  { %v450_v32 = vpop.xlane.xlu1 %449 }
 0x412   :  { %v452_v33 = vmul.f32 %v443_v31, %v443_v31  ;;  %v451_v34 = vmul.f32 0.015625, %v450_v32  ;;  %v459_v40 = vsel %vm456_vm3, %v443_v31, %v426_v26 }
 0x413   :  { %v461_v43 = vsub.f32 %v418_v18, %v459_v40 }
 0x414   :  { %v453_v37 = vsub.f32 %v451_v34, %v452_v33 }
 0x416   :  { %v454_v38 = vadd.f32 1e-05, %v453_v37 }
 0x418   :  { %656 = vrsqrt.f32 %v454_v38 }
 0x422   :  { %v657_v42 = vpop.eup %656 }
 0x423   :  { %v460_v44 = vsel %vm456_vm3, %v657_v42, %v655_v41 }
 0x424   :  { %v462_v46 = vmul.f32 %v461_v43, %v460_v44 }
 0x426   :  { %v470_v48 = vmul.f32 %v502_v45, %v462_v46 }
 0x428   :  { %v478_v49 = vadd.f32 %v503_v47, %v470_v48 }
 0x42a   :  { %479 = vst [vmem:[#allocation2] sm:$0xff] %v478_v49 }
 0x42b   :  { %669 = shalt.err (!%p666_p4)
}
 0x42c   :  { %s670_s24 = scalar_lea.hbm %s914_s11, 128 }
 0x42d   :  { %p671_p5 = scmp.ne.s32.totalorder %s914_s11, %s670_s24  ;;  %p674_p6 = scmp.lt.u32.totalorder %s670_s24, %s914_s11 }
 0x42f   :  { %p676_p7 = pnand %p674_p6, %p671_p5 }
 0x431   :  { %679 = shalt.err (!%p676_p7)
}
 0x432   :  { %489 = dma.vmem_to_hbm [thread:$0]  %s487_s22, 128, %s914_s11, [#allocation3]  }
 0x433   :  { %680 = dma.done.wait [#allocation3], 128  }
 0x434   :  { %681 = vsyncadd [#allocation3], 4294967168 }
 0x435   :  { %493 = vsyncpa [#allocation3], 1 }

</bundles_post_ra>
